<compile_context>
chip_gen: v6e
topology: v6e:2x2x1
jax: 0.10.0
libtpu: 0.0.40
codegen_flags: <defaults>
</compile_context>

<pallas_src>
import functools
import math

import numpy as np
import jax
import jax.numpy as jnp
from jax import lax
from jax.experimental import pallas as pl
from jax.experimental.pallas import tpu as pltpu


def _largest_divisor_leq(n, k):
    k = max(1, min(n, k))
    for d in range(k, 0, -1):
        if n % d == 0:
            return d
    return 1


def _gather_rows_kernel(idx_ref, x_ref, out_ref, *, rows):
    """Row gather at vreg granularity.

    idx_ref : (B*L,) int32 in SMEM (scalar prefetch, flattened sorted indices).
    x_ref   : (G, L, Dt) VMEM block (G batches, full sequence, one D tile).
    out_ref : (G, L, Dt) VMEM block.

    out[g, j, :] = x[g, sorted_idx[b0 + g, j], :]  with b0 = program_id(0) * G.
    """
    G, L, Dt = x_ref.shape
    n_groups = L // rows
    rem = L - n_groups * rows
    b0 = pl.program_id(0) * G

    # Hoisted once (don't re-materialize broadcasts inside the loop).
    sub_iota = lax.broadcasted_iota(jnp.int32, (rows, Dt), 0)

    for g in range(G):                     # static, small (batch group)
        base = (b0 + g) * L                # flat offset of this batch's indices

        def copy_group(gi, carry, g=g, base=base):
            r = pl.multiple_of(gi * rows, rows)
            # All SMEM index reads of the group issued up front (scalar slots
            # don't serialize against the vector loads below).
            srcs = [idx_ref[base + r + k] for k in range(rows)]
            # Assemble the (rows, Dt) destination tile in-vreg:
            #   masked single-row load -> sublane broadcast -> select into slot k.
            grp = jnp.broadcast_to(x_ref[g, pl.ds(srcs[0], 1), :], (rows, Dt))
            for k in range(1, rows):
                bc = jnp.broadcast_to(x_ref[g, pl.ds(srcs[k], 1), :], (rows, Dt))
                grp = jnp.where(sub_iota == k, bc, grp)
            # ONE sublane- and lane-dense store per group (was `rows` masked
            # stores in v1 -> this removes the vst-slot bottleneck).
            out_ref[g, pl.ds(r, rows), :] = grp
            return carry

        lax.fori_loop(0, n_groups, copy_group, 0)

        # Remainder rows (static count < rows, only when L % rows != 0).
        for k in range(rem):
            j = n_groups * rows + k
            out_ref[g, pl.ds(j, 1), :] = x_ref[g, pl.ds(idx_ref[base + j], 1), :]


def reorder_to_blockwise(x, mask):
    """x: (B, L, D), mask: (B, L) of 0/1 values.

    Returns (reordered_x (B, L, D), sorted_indices (B, L) int32) such that
    reordered_x[b, j] = x[b, sorted_indices[b, j]] with unmasked tokens first
    (stable argsort of the binary mask).
    """
    B, L, D = x.shape
    itemsize = jnp.dtype(x.dtype).itemsize

    # Tiny O(B*L) index computation in plain JAX (stable argsort of a binary
    # key); the bandwidth-heavy gather below is the Pallas kernel.
    sorted_idx = jnp.argsort(mask, axis=1).astype(jnp.int32)

    # Lane-dense feature dim: pad to a multiple of 128 if needed (review #3).
    d_pad = max(128, ((D + 127) // 128) * 128)
    x_in = x if d_pad == D else jnp.pad(x, ((0, 0), (0, 0), (0, d_pad - D)))

    # D tile: largest of {512, 384, 256, 128} dividing d_pad (review #4/#5).
    d_tile = next(t for t in (512, 384, 256, 128) if t <= d_pad and d_pad % t == 0)
    n_dt = d_pad // d_tile

    # Rows per dense store group: 8 sublanes * (32 bits / element bits).
    rows = max(8, (8 * 4) // itemsize)
    if L % rows != 0:
        rows = 8            # fall back to 32-bit sublane granularity
    # (any L % 8 remainder is handled row-by-row inside the kernel)

    # Batch grouping: amortize the ~0.35us/step overhead for small per-batch
    # blocks, but keep >= 2 grid steps when possible so the "parallel" axes can
    # shard across v7x's two TensorCores (review #6/#7).
    block_bytes = L * d_tile * itemsize
    G = _largest_divisor_leq(B, max(1, (1 << 20) // max(block_bytes, 1)))
    if G > 1 and (B // G) * n_dt < 2:
        G = _largest_divisor_leq(B, max(1, G // 2))
    n_b = B // G

    # Double-buffered in+out live set, with headroom (review: vmem_limit_bytes).
    needed = 4 * G * block_bytes
    vmem_limit = int(min(48 * 2 ** 20, max(16 * 2 ** 20, 2 * needed + (2 << 20))))

    kernel = functools.partial(_gather_rows_kernel, rows=rows)

    out = pl.pallas_call(
        kernel,
        out_shape=jax.ShapeDtypeStruct((B, L, d_pad), x.dtype),
        grid_spec=pltpu.PrefetchScalarGridSpec(
            num_scalar_prefetch=1,                      # flat sorted_idx -> SMEM
            grid=(n_b, n_dt),
            # index_maps receive the scalar-prefetch ref as a trailing arg.
            # TODO(synk): pipeline_mode=pl.Buffered(3) on the input spec if the
            # HBM DMA becomes exposed at small B (review #9).
            in_specs=[pl.BlockSpec((G, L, d_tile), lambda b, d, idx: (b, 0, d))],
            out_specs=pl.BlockSpec((G, L, d_tile), lambda b, d, idx: (b, 0, d)),
        ),
        compiler_params=pltpu.CompilerParams(
            dimension_semantics=("parallel", "parallel"),
            vmem_limit_bytes=vmem_limit,
        ),
    )(sorted_idx.reshape(-1), x_in)

    if d_pad != D:
        out = out[..., :D]
    return out, sorted_idx


class ReorderToBlockWiseMask:
    """JAX/Pallas port of the PyTorch module (mask generation is host glue)."""

    def __init__(self, masking_ratio, seed=0):
        self.masking_ratio = masking_ratio
        self._rng = np.random.default_rng(seed)

    def generate_mask_block(self, input_height, input_width, min_size, max_size):
        r = self._rng.random(4)
        block_size = min_size + r[0] * (max_size - min_size)
        aspect_ratio = 0.3 + r[1] * (1.0 / 0.3 - 0.3)
        block_height = math.sqrt(block_size * aspect_ratio)
        block_width = math.sqrt(block_size / aspect_ratio)
        block_upper_float = r[2] * (input_height - block_height)
        block_left_float = r[3] * (input_width - block_width)
        block_upper = int(block_upper_float)
        block_lower = math.ceil(block_upper_float + block_height)
        block_left = int(block_left_float)
        block_right = math.ceil(block_left_float + block_width)
        return block_upper, block_lower, block_left, block_right

    def generate_mask(self, batch_size, seq_length):
        target_mask_size = int(self.masking_ratio * seq_length)
        num_patches_height = int(math.sqrt(seq_length))
        num_patches_width = seq_length // num_patches_height
        min_block_size = 16
        full_mask = np.zeros((batch_size, seq_length), dtype=np.float32)
        for batch_num in range(batch_size):
            mask = np.zeros((num_patches_height, num_patches_width), dtype=bool)
            remaining = target_mask_size
            while remaining > 0:
                max_block_size = max(min_block_size, remaining)
                bu, bl, le, ri = self.generate_mask_block(
                    num_patches_height, num_patches_width,
                    min_block_size, max_block_size)
                mask[bu:bl, le:ri] = True
                remaining = target_mask_size - int(mask.sum())
            full_mask[batch_num] = mask.reshape(seq_length).astype(np.float32)
        return jnp.asarray(full_mask)

    def __call__(self, x, blocks=None, key=None):
        B, L, D = x.shape
        if blocks is None:
            mask = self.generate_mask(B, L)
        else:
            key = jax.random.PRNGKey(0) if key is None else key
            block_indices = jax.random.randint(key, (B,), 0, blocks.shape[0])
            mask = blocks[block_indices]
        reordered_x, idx = reorder_to_blockwise(x, mask)
        # Torch forward contract: (B, L, D) expanded indices.  Perf note:
        # prefer consuming the compact (B, L) `idx`; this broadcast adds an
        # extra B*L*D int32 of HBM writes outside the kernel.
        expanded_idx = jnp.broadcast_to(idx[:, :, None], (B, L, D))
        return reordered_x, expanded_idx


if __name__ == "__main__":
    B, L, D = 2, 64, 128          # seq_length 64 -> 8x8 patch grid, lane-dense D
    key = jax.random.PRNGKey(0)
    x = jax.random.normal(key, (B, L, D), dtype=jnp.float32)

    module = ReorderToBlockWiseMask(masking_ratio=0.5, seed=0)
    mask = module.generate_mask(B, L)                 # deterministic (seeded) mask

    reordered_x, idx = reorder_to_blockwise(x, mask)
    reordered_x = jax.block_until_ready(reordered_x)
    idx = jax.block_until_ready(idx)

    # Independent numpy reference: stable argsort of the binary mask + gather.
    mask_np = np.asarray(mask)
    ref_idx = np.argsort(mask_np, axis=1, kind="stable")
    ref_out = np.take_along_axis(np.asarray(x), ref_idx[:, :, None], axis=1)

    assert reordered_x.shape == (B, L, D)
    assert idx.shape == (B, L)
    np.testing.assert_array_equal(np.asarray(idx), ref_idx)
    # Exact copy: native dtype preserved, no MXU / precision involvement.
    np.testing.assert_array_equal(np.asarray(reordered_x), ref_out)

    # Also exercise the D % 128 != 0 padding path (module allows any D).
    D2 = 32
    x2 = jax.random.normal(jax.random.PRNGKey(1), (B, L, D2), dtype=jnp.float32)
    out2, idx2 = reorder_to_blockwise(x2, mask)
    out2 = jax.block_until_ready(out2)
    ref_out2 = np.take_along_axis(np.asarray(x2), np.asarray(idx2)[:, :, None], axis=1)
    np.testing.assert_array_equal(np.asarray(out2), ref_out2)

    # Module-level call (full torch forward contract incl. expanded indices).
    mod_out, mod_expanded = module(x)
    mod_out = jax.block_until_ready(mod_out)
    mod_expanded = jax.block_until_ready(mod_expanded)
    assert mod_out.shape == (B, L, D)
    assert mod_expanded.shape == (B, L, D)

    print("KERNEL_OK")
</pallas_src>

<mosaic_0001>
module attributes {stable_mosaic.version = 11 : i64} {
  func.func @_gather_rows_kernel(%arg0: i32, %arg1: i32, %arg2: memref<128xi32, #tpu.memory_space<smem>>, %arg3: memref<1x64x128xf32, #tpu.memory_space<vmem>>, %arg4: memref<1x64x128xf32, #tpu.memory_space<vmem>>) attributes {dimension_semantics = [#tpu.dimension_semantics<parallel>, #tpu.dimension_semantics<parallel>], iteration_bounds = array<i64: 2, 1>, scalar_prefetch = 1 : i64, scratch_operands = 0 : i64, tpu.core_type = #tpu.core_type<tc>, window_params = [{transform_indices = @transform_0, window_bounds = array<i64: 1, 64, 128>}, {transform_indices = @transform_1, window_bounds = array<i64: 1, 64, 128>}]} {
    %c1_i32 = arith.constant 1 : i32
    %0 = arith.muli %arg0, %c1_i32 : i32
    %1 = tpu.iota {dimensions = array<i32: 0>} : vector<8x128xi32>
    %c0_i32 = arith.constant 0 : i32
    %2 = arith.addi %0, %c0_i32 : i32
    %c64_i32 = arith.constant 64 : i32
    %3 = arith.muli %2, %c64_i32 : i32
    %c0_i32_0 = arith.constant 0 : i32
    %c8_i32 = arith.constant 8 : i32
    %4 = arith.addi %c0_i32_0, %c8_i32 : i32
    %c1_i32_1 = arith.constant 1 : i32
    scf.for %arg5 = %c0_i32_0 to %4 step %c1_i32_1  : i32 {
      %c8_i32_3 = arith.constant 8 : i32
      %5 = arith.muli %arg5, %c8_i32_3 : i32
      %6 = tpu.assume_multiple %5, 8 : i32
      %7 = arith.addi %3, %6 : i32
      %c0_i32_4 = arith.constant 0 : i32
      %8 = arith.addi %7, %c0_i32_4 : i32
      %9 = arith.index_cast %8 : i32 to index
      %10 = memref.load %arg2[%9] : memref<128xi32, #tpu.memory_space<smem>>
      %11 = arith.addi %3, %6 : i32
      %c1_i32_5 = arith.constant 1 : i32
      %12 = arith.addi %11, %c1_i32_5 : i32
      %13 = arith.index_cast %12 : i32 to index
      %14 = memref.load %arg2[%13] : memref<128xi32, #tpu.memory_space<smem>>
      %15 = arith.addi %3, %6 : i32
      %c2_i32 = arith.constant 2 : i32
      %16 = arith.addi %15, %c2_i32 : i32
      %17 = arith.index_cast %16 : i32 to index
      %18 = memref.load %arg2[%17] : memref<128xi32, #tpu.memory_space<smem>>
      %19 = arith.addi %3, %6 : i32
      %c3_i32 = arith.constant 3 : i32
      %20 = arith.addi %19, %c3_i32 : i32
      %21 = arith.index_cast %20 : i32 to index
      %22 = memref.load %arg2[%21] : memref<128xi32, #tpu.memory_space<smem>>
      %23 = arith.addi %3, %6 : i32
      %c4_i32 = arith.constant 4 : i32
      %24 = arith.addi %23, %c4_i32 : i32
      %25 = arith.index_cast %24 : i32 to index
      %26 = memref.load %arg2[%25] : memref<128xi32, #tpu.memory_space<smem>>
      %27 = arith.addi %3, %6 : i32
      %c5_i32 = arith.constant 5 : i32
      %28 = arith.addi %27, %c5_i32 : i32
      %29 = arith.index_cast %28 : i32 to index
      %30 = memref.load %arg2[%29] : memref<128xi32, #tpu.memory_space<smem>>
      %31 = arith.addi %3, %6 : i32
      %c6_i32 = arith.constant 6 : i32
      %32 = arith.addi %31, %c6_i32 : i32
      %33 = arith.index_cast %32 : i32 to index
      %34 = memref.load %arg2[%33] : memref<128xi32, #tpu.memory_space<smem>>
      %35 = arith.addi %3, %6 : i32
      %c7_i32 = arith.constant 7 : i32
      %36 = arith.addi %35, %c7_i32 : i32
      %37 = arith.index_cast %36 : i32 to index
      %38 = memref.load %arg2[%37] : memref<128xi32, #tpu.memory_space<smem>>
      %c0 = arith.constant 0 : index
      %39 = arith.index_cast %10 : i32 to index
      %c0_6 = arith.constant 0 : index
      %40 = vector.load %arg3[%c0, %39, %c0_6] : memref<1x64x128xf32, #tpu.memory_space<vmem>>, vector<1x1x128xf32>
      %41 = vector.shape_cast %40 : vector<1x1x128xf32> to vector<1x128xf32>
      %42 = vector.shape_cast %41 : vector<1x128xf32> to vector<1x128xf32>
      %43 = vector.broadcast %42 : vector<1x128xf32> to vector<8x128xf32>
      %c0_7 = arith.constant 0 : index
      %44 = arith.index_cast %14 : i32 to index
      %c0_8 = arith.constant 0 : index
      %45 = vector.load %arg3[%c0_7, %44, %c0_8] : memref<1x64x128xf32, #tpu.memory_space<vmem>>, vector<1x1x128xf32>
      %46 = vector.shape_cast %45 : vector<1x1x128xf32> to vector<1x128xf32>
      %47 = vector.shape_cast %46 : vector<1x128xf32> to vector<1x128xf32>
      %48 = vector.broadcast %47 : vector<1x128xf32> to vector<8x128xf32>
      %c1_i32_9 = arith.constant 1 : i32
      %49 = vector.broadcast %c1_i32_9 : i32 to vector<8x128xi32>
      %50 = arith.cmpi eq, %1, %49 : vector<8x128xi32>
      %51 = arith.select %50, %48, %43 : vector<8x128xi1>, vector<8x128xf32>
      %c0_10 = arith.constant 0 : index
      %52 = arith.index_cast %18 : i32 to index
      %c0_11 = arith.constant 0 : index
      %53 = vector.load %arg3[%c0_10, %52, %c0_11] : memref<1x64x128xf32, #tpu.memory_space<vmem>>, vector<1x1x128xf32>
      %54 = vector.shape_cast %53 : vector<1x1x128xf32> to vector<1x128xf32>
      %55 = vector.shape_cast %54 : vector<1x128xf32> to vector<1x128xf32>
      %56 = vector.broadcast %55 : vector<1x128xf32> to vector<8x128xf32>
      %c2_i32_12 = arith.constant 2 : i32
      %57 = vector.broadcast %c2_i32_12 : i32 to vector<8x128xi32>
      %58 = arith.cmpi eq, %1, %57 : vector<8x128xi32>
      %59 = arith.select %58, %56, %51 : vector<8x128xi1>, vector<8x128xf32>
      %c0_13 = arith.constant 0 : index
      %60 = arith.index_cast %22 : i32 to index
      %c0_14 = arith.constant 0 : index
      %61 = vector.load %arg3[%c0_13, %60, %c0_14] : memref<1x64x128xf32, #tpu.memory_space<vmem>>, vector<1x1x128xf32>
      %62 = vector.shape_cast %61 : vector<1x1x128xf32> to vector<1x128xf32>
      %63 = vector.shape_cast %62 : vector<1x128xf32> to vector<1x128xf32>
      %64 = vector.broadcast %63 : vector<1x128xf32> to vector<8x128xf32>
      %c3_i32_15 = arith.constant 3 : i32
      %65 = vector.broadcast %c3_i32_15 : i32 to vector<8x128xi32>
      %66 = arith.cmpi eq, %1, %65 : vector<8x128xi32>
      %67 = arith.select %66, %64, %59 : vector<8x128xi1>, vector<8x128xf32>
      %c0_16 = arith.constant 0 : index
      %68 = arith.index_cast %26 : i32 to index
      %c0_17 = arith.constant 0 : index
      %69 = vector.load %arg3[%c0_16, %68, %c0_17] : memref<1x64x128xf32, #tpu.memory_space<vmem>>, vector<1x1x128xf32>
      %70 = vector.shape_cast %69 : vector<1x1x128xf32> to vector<1x128xf32>
      %71 = vector.shape_cast %70 : vector<1x128xf32> to vector<1x128xf32>
      %72 = vector.broadcast %71 : vector<1x128xf32> to vector<8x128xf32>
      %c4_i32_18 = arith.constant 4 : i32
      %73 = vector.broadcast %c4_i32_18 : i32 to vector<8x128xi32>
      %74 = arith.cmpi eq, %1, %73 : vector<8x128xi32>
      %75 = arith.select %74, %72, %67 : vector<8x128xi1>, vector<8x128xf32>
      %c0_19 = arith.constant 0 : index
      %76 = arith.index_cast %30 : i32 to index
      %c0_20 = arith.constant 0 : index
      %77 = vector.load %arg3[%c0_19, %76, %c0_20] : memref<1x64x128xf32, #tpu.memory_space<vmem>>, vector<1x1x128xf32>
      %78 = vector.shape_cast %77 : vector<1x1x128xf32> to vector<1x128xf32>
      %79 = vector.shape_cast %78 : vector<1x128xf32> to vector<1x128xf32>
      %80 = vector.broadcast %79 : vector<1x128xf32> to vector<8x128xf32>
      %c5_i32_21 = arith.constant 5 : i32
      %81 = vector.broadcast %c5_i32_21 : i32 to vector<8x128xi32>
      %82 = arith.cmpi eq, %1, %81 : vector<8x128xi32>
      %83 = arith.select %82, %80, %75 : vector<8x128xi1>, vector<8x128xf32>
      %c0_22 = arith.constant 0 : index
      %84 = arith.index_cast %34 : i32 to index
      %c0_23 = arith.constant 0 : index
      %85 = vector.load %arg3[%c0_22, %84, %c0_23] : memref<1x64x128xf32, #tpu.memory_space<vmem>>, vector<1x1x128xf32>
      %86 = vector.shape_cast %85 : vector<1x1x128xf32> to vector<1x128xf32>
      %87 = vector.shape_cast %86 : vector<1x128xf32> to vector<1x128xf32>
      %88 = vector.broadcast %87 : vector<1x128xf32> to vector<8x128xf32>
      %c6_i32_24 = arith.constant 6 : i32
      %89 = vector.broadcast %c6_i32_24 : i32 to vector<8x128xi32>
      %90 = arith.cmpi eq, %1, %89 : vector<8x128xi32>
      %91 = arith.select %90, %88, %83 : vector<8x128xi1>, vector<8x128xf32>
      %c0_25 = arith.constant 0 : index
      %92 = arith.index_cast %38 : i32 to index
      %c0_26 = arith.constant 0 : index
      %93 = vector.load %arg3[%c0_25, %92, %c0_26] : memref<1x64x128xf32, #tpu.memory_space<vmem>>, vector<1x1x128xf32>
      %94 = vector.shape_cast %93 : vector<1x1x128xf32> to vector<1x128xf32>
      %95 = vector.shape_cast %94 : vector<1x128xf32> to vector<1x128xf32>
      %96 = vector.broadcast %95 : vector<1x128xf32> to vector<8x128xf32>
      %c7_i32_27 = arith.constant 7 : i32
      %97 = vector.broadcast %c7_i32_27 : i32 to vector<8x128xi32>
      %98 = arith.cmpi eq, %1, %97 : vector<8x128xi32>
      %99 = arith.select %98, %96, %91 : vector<8x128xi1>, vector<8x128xf32>
      %c0_28 = arith.constant 0 : index
      %100 = arith.index_cast %6 : i32 to index
      %c0_29 = arith.constant 0 : index
      %101 = vector.load %arg4[%c0_28, %100, %c0_29] : memref<1x64x128xf32, #tpu.memory_space<vmem>>, vector<1x8x128xf32>
      %102 = vector.shape_cast %101 : vector<1x8x128xf32> to vector<8x128xf32>
      %103 = vector.shape_cast %99 : vector<8x128xf32> to vector<1x8x128xf32>
      tpu.vector_store %arg4[%c0_28, %100, %c0_29], %103 {strides = array<i32>} : memref<1x64x128xf32, #tpu.memory_space<vmem>>, vector<1x8x128xf32>,
    }
    %c8_i32_2 = arith.constant 8 : i32
    return
  }
  func.func @transform_0(%arg0: i32, %arg1: i32, %arg2: memref<128xi32, #tpu.memory_space<smem>>) -> (i32, i32, i32) {
    %c0_i32 = arith.constant 0 : i32
    %c0_i32_0 = arith.constant 0 : i32
    return %arg0, %c0_i32, %arg1 : i32, i32, i32
  }
  func.func @transform_1(%arg0: i32, %arg1: i32, %arg2: memref<128xi32, #tpu.memory_space<smem>>) -> (i32, i32, i32) {
    %c0_i32 = arith.constant 0 : i32
    %c0_i32_0 = arith.constant 0 : i32
    return %arg0, %c0_i32, %arg1 : i32, i32, i32
  }
}

</mosaic_0001>

<bundles_post_ra>
// kernel: tpu_custom_call.1
= control target key start
LH: loop header
LB: loop body
LE: loop exit
PB: predicated region body
PF: predicated region fallthrough
CT: control target
= control target key end

     0   :  { %s592_s9 = smov [#allocation3]   ;;  %s793_s0 = inlined_call_operand.hbm [shape: s32[128], index: 0, kind: input, shape index: {}]   ;;  %s794_s1 = inlined_call_operand.hbm [shape: f32[2,64,128], index: 1, kind: input, shape index: {}]   ;;  %s795_s2 = inlined_call_operand.hbm [shape: f32[2,64,128], index: 2, kind: output, shape index: {}]  }
   0x1   :  { %799 = sst [smem:[#allocation13_spill]] %s794_s1 }
   0x2   :  { %8 = dma.hbm_to_smem %s793_s0, 16, %s592_s9, [#allocation2] }
   0x3   :  { %554 = dma.done.wait [#allocation2], 16 }
   0x4   :  { %555 = vsyncadd [#allocation2], 4294967280 }
   0x5   :  { %10 = sfence }
   0x6   :  { %11 = vsyncpa [#allocation5], 0 }
   0x7   :  { %13 = vsyncpa [#allocation5 + $0x1], 0 }
   0x8   :  { %14 = vsyncpa [#allocation6], 0 }
   0x9   :  { %16 = vsyncpa [#allocation6 + $0x1], 0  ;;  %s617_s12 = smov 0   ;;  %s619_s13 = smov 0  }
   0xa   :  { %s621_s14 = smov 0   ;;  %s623_s15 = smov 0  }
   0xb   :  { %s625_s16 = smov 0   ;;  %s627_s17 = smov 0  }
   0xc LB: > { %800 = sst [smem:[#allocation11_spill]] %s582_s16  ;;  %s362_s0 = sadd.s32 4294967295, %s586_s17   ;;  %s586_s17 = sphi %s627_s17, %s22_s17   ;;  %s582_s16 = sphi %s625_s16, %s812_s16   ;;  %s578_s15 = sphi %s623_s15, %s811_s15   ;;  %s574_s14 = sphi %s621_s14, %s815_s14   ;;  %s570_s13 = sphi %s619_s13, %s814_s13   ;;  %s566_s12 = sphi %s617_s12, %s813_s12  }
   0xd   : > { %s363_s18 = sadd.s32 4294967294, %s586_s17   ;;  %s34_s19 = sadd.s32 1, %s582_s16 }
   0xe   : > { %s43_s20 = sadd.s32 1, %s574_s14  ;;  %p36_p0 = scmp.ge.s32.totalorder %s34_s19, 2 }
   0xf   : > { %p50_p1 = scmp.ne.s32.totalorder %s574_s14, %s570_s13  ;;  %p51_p2 = scmp.eq.s32.totalorder %s586_s17, 0 }
  0x10   : > { %p56_p3 = scmp.ne.s32.totalorder %s570_s13, %s566_s12  ;;  %s817_s19 = smov (%p36_p0, %s34_s19), 0 }
  0x11   : > { %801 = sst [smem:[#allocation12_spill]] %s817_s19  ;;  %p658_p4 = por %p51_p2, %p50_p1 }
  0x12   : > { %p57_p5 = scmp.eq.s32.totalorder %s362_s0, 0  ;;  %s38_s22 = ssub.s32 %s582_s16, %s817_s19 }
  0x13   : > { %p82_p6 = scmp.eq.s32.totalorder %s362_s0, 1  ;;  %p41_p7 = scmp.eq.s32.totalorder %s38_s22, 0 }
  0x14   : > { %p664_p8 = por %p57_p5, %p56_p3  ;;  %p88_p10 = scmp.eq.s32.totalorder %s363_s18, 1 }
  0x15   : > { %p668_p9 = por %p82_p6, %p50_p1  ;;  %p401_p13 = scmp.lt.s32.totalorder %s586_s17, 2 }
  0x16   : > { %s673_s25 = scalar_select %p41_p7, %s574_s14, %s43_s20  }
  0x17   : > { %p675_p11 = por %p88_p10, %p56_p3  ;;  %s108_s27 = sand.u32 1, %s574_s14  }
  0x18   : > { %s366_s28 = sshll.u32 %s108_s27, 6  ;;  %s387_s29 = sshll.u32 %s582_s16, 10 }
  0x19   : > { %s806_s1 = sld [smem:[#allocation13_spill]]  ;;  %s112_s5 = scalar_lea.vmem [#allocation4], %s366_s28 }
  0x1a   : > { %s120_s6 = sshll.u32 %s112_s5, 4  ;;  %p688_p0 = pnand %p401_p13, %p658_p4  ;;  %s121_s6 = int_to_ptr.vmem [resolvable:$true] %s120_s6 }
  0x1b   : > { %p369_p1 = scmp.ge.s32.totalorder %s586_s17, 1  ;;  %s109_s8 = scalar_lea.sflag [#allocation5], %s108_s27 }
  0x1c   : > { %p474_p2 = pneg %p688_p0  ;;  %s485_s9 = scalar_lea.vmem %s121_s6, 1024 }
  0x1d   : > { %p486_p3 = scmp.ne.s32.totalorder %s121_s6, %s485_s9  ;;  %s593_s10 = smov [#allocation4]  }
  0x1e   : > { %s490_s11 = sshll.u32 %s593_s10, 4  ;;  %s491_s11 = int_to_ptr.vmem [resolvable:$false] %s490_s11 }
  0x1f   : > { %s119_s4 = scalar_lea.hbm %s806_s1, %s387_s29  ;;  %p488_p5 = pnand %p486_p3, %p474_p2 }
  0x20   : > { %s492_s0 = scalar_lea.vmem %s491_s11, 2048  ;;  %p493_p7 = scmp.lt.s32.totalorder %s121_s6, %s491_s11 }
  0x21   : > { %p489_p6 = pneg %p488_p5  ;;  %p494_p10 = scmp.lt.s32.totalorder %s492_s0, %s485_s9 }
  0x23   : > { %p495_p12 = por %p494_p10, %p493_p7 }
  0x25   : > { %p496_p4 = pnand %p495_p12, %p489_p6 }
  0x27   : > { %499 = shalt.err (!%p496_p4)
}
  0x28   : > { %s594_s18 = smov 128   ;;  %s595_s20 = smov 8  }
  0x29   : > { %396 = dma.hbm_to_vmem [thread:$0]  (!%p688_p0), %s119_s4, 1024, %s121_s6, %s109_s8, %s594_s18, %s594_s18, %s595_s20  }
  0x2a   : > { %p128_p13 = scmp.lt.s32.totalorder %s586_s17, 3 }
  0x2c   : > { %p129_p2 = pnand %p369_p1, %p128_p13 }
  0x2d   : > { %s701_s21 = sand.u32 (!%p129_p2), 1, %s570_s13  }
  0x2e   : > { %132 = sbr.rel (%p129_p2) target bundleno = 95 (0x5f), region = 24  ;;  %s370_s22 = sshll.u32 (!%p129_p2), %s701_s21, 6 }
  0x2f   : > { %s135_s27 = scalar_lea.sflag (!%p129_p2), [#allocation5], %s701_s21  ;;  %s705_s28 = scalar_lea.vmem (!%p129_p2), [#allocation4], %s370_s22 }
  0x33   : > { %557 = dma.done.wait (%p664_p8), %s135_s27, 1024  }
  0x34   : > { %559 = vsyncadd (%p664_p8), %s135_s27, 4294966272  ;;  %v157_v0 = vlaneseq  ;;  %s712_s30 = scalar_lea.vmem [#allocation7], %s370_s22  ;;  %s714_s3 = smov 0  }
  0x36   : > { %v158_v1 = vshrl.u32 %v157_v0, 7 }
  0x37 LB: >> { %s797_s4 = sshll.u32 %s590_s3, 3  ;;  %s808_s29 = sshll.u32 %s578_s15, 6  ;;  %s590_s3 = sphi %s714_s3, %s165_s3  }
  0x38   : >> { %s167_s23 = sadd.s32 %s797_s4, %s808_s29  ;;  %vm195_vm0 = vcmp.eq.s32.totalorder %v158_v1, 1  ;;  %vm203_vm1 = vcmp.eq.s32.totalorder %v158_v1, 2  ;;  %vm211_vm2 = vcmp.eq.s32.totalorder %v158_v1, 3  ;;  %vm219_vm3 = vcmp.eq.s32.totalorder %v158_v1, 4 }
  0x39   : >> { %s168_s5 = sld [smem:[#allocation3 + %s167_s23]]  ;;  %s169_s6 = sadd.s32 1, %s167_s23  ;;  %vm227_vm4 = vcmp.eq.s32.totalorder %v158_v1, 5  ;;  %vm235_vm5 = vcmp.eq.s32.totalorder %v158_v1, 6  ;;  %vm243_vm6 = vcmp.eq.s32.totalorder %v158_v1, 7 }
  0x3a   : >> { %s170_s7 = sld [smem:[#allocation3 + %s169_s6]]  ;;  %s171_s8 = sadd.s32 2, %s167_s23 }
  0x3b   : >> { %s172_s9 = sld [smem:[#allocation3 + %s171_s8]]  ;;  %s173_s10 = sadd.s32 3, %s167_s23 }
  0x3c   : >> { %s174_s11 = sld [smem:[#allocation3 + %s173_s10]]  ;;  %s175_s0 = sadd.s32 4, %s167_s23 }
  0x3d   : >> { %s176_s18 = sld [smem:[#allocation3 + %s175_s0]]  ;;  %s177_s20 = sadd.s32 5, %s167_s23 }
  0x3e   : >> { %s178_s22 = sld [smem:[#allocation3 + %s177_s20]]  ;;  %s179_s27 = sadd.s32 6, %s167_s23 }
  0x3f   : >> { %s180_s1 = sld [smem:[#allocation3 + %s179_s27]]  ;;  %s181_s19 = sadd.s32 7, %s167_s23 }
  0x40   : >> { %s182_s29 = sld [smem:[#allocation3 + %s181_s19]]  ;;  %s183_s4 = scalar_lea.vmem %s705_s28, %s168_s5 [#allocation4] }
  0x41   : >> { %v374_v2 = vld [vmem:[%s183_s4] ss:$0 sm:$0xff]  ;;  %s189_s6 = scalar_lea.vmem %s705_s28, %s170_s7 [#allocation4]  ;;  %s197_s16 = scalar_lea.vmem %s705_s28, %s172_s9 [#allocation4] }
  0x42   : >> { %v375_v3 = vld [vmem:[%s189_s6] ss:$0 sm:$0xff]  ;;  %s205_s8 = scalar_lea.vmem %s705_s28, %s174_s11 [#allocation4]  ;;  %s809_s23 = sshll.u32 %s590_s3, 3 }
  0x43   : >> { %v376_v4 = vld [vmem:[%s197_s16] ss:$0 sm:$0xff]  ;;  %v196_v5 = vsel %vm195_vm0, %v375_v3, %v374_v2  ;;  %s213_s10 = scalar_lea.vmem %s705_s28, %s176_s18 [#allocation4]  ;;  %s245_s5 = scalar_lea.vmem %s712_s30, %s809_s23 [#allocation7] }
  0x44   : >> { %v377_v6 = vld [vmem:[%s205_s8] ss:$0 sm:$0xff]  ;;  %v204_v7 = vsel %vm203_vm1, %v376_v4, %v196_v5  ;;  %s221_s19 = scalar_lea.vmem %s705_s28, %s178_s22 [#allocation4]  ;;  %s165_s3 = sadd.s32 1, %s590_s3  }
  0x45   : >> { %v378_v8 = vld [vmem:[%s213_s10] ss:$0 sm:$0xff]  ;;  %v212_v9 = vsel %vm211_vm2, %v377_v6, %v204_v7  ;;  %s229_s4 = scalar_lea.vmem %s705_s28, %s180_s1 [#allocation4]  ;;  %p162_p8 = scmp.ge.s32.totalorder %s165_s3, 8  }
  0x46   : >> { %v379_v10 = vld [vmem:[%s221_s19] ss:$0 sm:$0xff]  ;;  %v220_v11 = vsel %vm219_vm3, %v378_v8, %v212_v9  ;;  %s237_s16 = scalar_lea.vmem %s705_s28, %s182_s29 [#allocation4]  ;;  %s388_s1 = sshll.u32 (%p162_p8), %s578_s15, 10 }
  0x47   : >> { %v380_v12 = vld [vmem:[%s229_s4] ss:$0 sm:$0xff]  ;;  %v228_v13 = vsel %vm227_vm4, %v379_v10, %v220_v11  ;;  %164 = sbr.rel (!%p162_p8) target bundleno = 55 (0x37), region = 85  ;;  %s742_s9 = scalar_lea.hbm (%p162_p8), %s795_s2, %s388_s1 }
  0x48   : >> { %v381_v14 = vld [vmem:[%s237_s16] ss:$0 sm:$0xff]  ;;  %v236_v15 = vsel %vm235_vm5, %v380_v12, %v228_v13  ;;  %s262_s11 = sshll.u32 (%p162_p8), %s712_s30, 4  ;;  %s248_s0 = scalar_lea.sflag (%p162_p8), [#allocation6], %s701_s21  ;;  %s745_s11 = int_to_ptr.vmem [resolvable:$true] %s262_s11 }
  0x49   : >> { %v244_v16 = vsel %vm243_vm6, %v381_v14, %v236_v15  ;;  %s500_s18 = scalar_lea.vmem (%p162_p8), %s745_s11, 1024  ;;  %s596_s28 = smov (%p162_p8), [#allocation7]  }
  0x4a   : >> { %246 = vst [vmem:[%s245_s5] sm:$0xff] %v244_v16  ;;  %p501_p12 = scmp.ne.s32.totalorder (%p162_p8), %s745_s11, %s500_s18  ;;  %s504_s3 = sshll.u32 (%p162_p8), %s596_s28, 4  ;;  %s505_s3 = int_to_ptr.vmem [resolvable:$false] %s504_s3 }
  0x4b   : > { %s506_s15 = scalar_lea.vmem (%p162_p8), %s505_s3, 2048  ;;  %p507_p3 = scmp.lt.s32.totalorder (%p162_p8), %s745_s11, %s505_s3 }
  0x4c   : > { %p502_p0 = pnand %p501_p12, %p668_p9  ;;  %p508_p5 = scmp.lt.s32.totalorder %s506_s15, %s500_s18 }
  0x4e   : > { %p503_p1 = pneg %p502_p0  ;;  %p509_p6 = por %p508_p5, %p507_p3 }
  0x50   : > { %p510_p7 = pnand %p509_p6, %p503_p1 }
  0x52   : > { %513 = shalt.err (!%p510_p7)
}
  0x53   : > { %s514_s30 = scalar_lea.hbm %s742_s9, 1024  ;;  %s518_s27 = scalar_lea.hbm %s795_s2, 2048 }
  0x54   : > { %p515_p10 = scmp.ne.s32.totalorder %s742_s9, %s514_s30  ;;  %p519_p2 = scmp.lt.s32.totalorder %s742_s9, %s795_s2 }
  0x55   : > { %p520_p8 = scmp.lt.s32.totalorder %s518_s27, %s514_s30 }
  0x56   : > { %p516_p4 = pnand %p515_p10, %p668_p9 }
  0x57   : > { %p521_p12 = por %p520_p8, %p519_p2 }
  0x58   : > { %p517_p13 = pneg %p516_p4 }
  0x5a   : > { %p522_p0 = pnand %p521_p12, %p517_p13 }
  0x5c   : > { %525 = shalt.err (!%p522_p0)
}
  0x5d   : > { %s597_s10 = smov 128   ;;  %s598_s19 = smov 8  }
  0x5e   : > { %391 = dma.vmem_to_hbm [thread:$0]  (%p668_p9), %s745_s11, 1024, %s742_s9, %s248_s0, %s597_s10, %s597_s10, %s598_s19  }
  0x5f PF: > { %s277_s4 = sand.u32 1, %s566_s12   ;;  %p810_p1 = scmp.ge.s32.totalorder %s586_s17, 2 }
  0x60   : > { %s278_s16 = scalar_lea.sflag [#allocation6], %s277_s4 }
  0x61   : > { %p398_p3 = pnand %p810_p1, %p675_p11 }
  0x63   : > { %p399_p5 = pneg %p398_p3 }
  0x65   : > { %561 = dma.done.wait (%p399_p5), %s278_s16, 1024  }
  0x66   : > { %563 = vsyncadd (%p399_p5), %s278_s16, 4294966272  ;;  %s22_s17 = sadd.s32 1, %s586_s17   ;;  %s811_s15 = sld [smem:[#allocation11_spill]] }
  0x67   : > { %p19_p6 = scmp.ge.s32.totalorder %s22_s17, 4   ;;  %s812_s16 = sld [smem:[#allocation12_spill]] }
  0x68   : > { %s813_s12 = smov %s570_s13  ;;  %s814_s13 = smov %s574_s14 }
  0x69   : > { %s815_s14 = smov %s673_s25  ;;  %21 = sbr.rel (!%p19_p6) target bundleno = 12 (0xc), region = 96 }
  0x6e   :  { %283 = vsyncpa [#allocation5], 1 }
  0x6f   :  { %285 = vsyncpa [#allocation5 + $0x1], 1 }
  0x70   :  { %286 = vsyncpa [#allocation6], 1 }
  0x71   :  { %288 = vsyncpa [#allocation6 + $0x1], 1 }

</bundles_post_ra>
